<compile_context>
chip_gen: v7x
topology: tpu7x:2x2x1
jax: 0.10.0
libtpu: 0.0.40
codegen_flags: <defaults>
</compile_context>

<pallas_src>
import jax
import jax.numpy as jnp
from jax.experimental import pallas as pl
from jax.experimental.pallas import tpu as pltpu


D_PAD = 128  # padded input-feature dim (lane width); real D=100 is zero-padded


def lstm_fc_kernel(x_ref, wih_ref, whh_ref, b_ref, wfc_ref, bfc_ref, out_ref):
    """Whole-sequence LSTM + final Linear, computed entirely in VMEM.

    x_ref   : (T*B, Dp) bfloat16  (row t*B + b holds x[b, t, :], time-major,
                                   zero-padded to Dp=128 feature lanes)
    wih_ref : (Dp, 4H)  bfloat16  (transposed, row-padded PyTorch weight_ih_l0)
    whh_ref : (H, 4H)   bfloat16  (transposed PyTorch weight_hh_l0)
    b_ref   : (1, 4H)   float32   (b_ih + b_hh)
    wfc_ref : (H, O)    bfloat16  (transposed fc.weight)
    bfc_ref : (1, O)    float32   (fc.bias)
    out_ref : (B, O)    float32

    Invariant: rows of x_ref are packed time-major, T = (T*B) // B exactly.
    """
    TB = x_ref.shape[0]
    H = whh_ref.shape[0]
    B = out_ref.shape[0]
    T = TB // B

    # --- Hoisted input projection + bias: one well-filled MXU matmul and one
    # --- full-tile VPU add, both off the serial chain. -----------------------
    xw = (
        jnp.dot(x_ref[...], wih_ref[...], preferred_element_type=jnp.float32)
        + b_ref[...]
    )                                                       # (T*B, 4H) f32

    whh = whh_ref[...]        # (H, 4H) bf16 -- only recurrent weight stays live

    h = jnp.zeros((B, H), jnp.float32)
    c = jnp.zeros((B, H), jnp.float32)

    # --- Fully unrolled recurrence (T is small and static). -------------------
    for t in range(T):
        gates = xw[t * B:(t + 1) * B, :] + jnp.dot(
            h.astype(jnp.bfloat16), whh, preferred_element_type=jnp.float32
        )                                                   # (B, 4H) f32

        # Single-EUP sigmoid: sigmoid(z) = 0.5*tanh(0.5*z) + 0.5, evaluated over
        # the full 4H-lane tile.  tanh also over the full tile so both share
        # layout; gate order matches PyTorch: [i, f, g, o].
        sg = 0.5 * jnp.tanh(0.5 * gates) + 0.5
        tg = jnp.tanh(gates)

        i_g = sg[:, 0:H]
        f_g = sg[:, H:2 * H]
        o_g = sg[:, 3 * H:4 * H]
        g_g = tg[:, 2 * H:3 * H]

        c = f_g * c + i_g * g_g
        h = o_g * jnp.tanh(c)

    # --- Final Linear on the last hidden state (bf16 MXU, f32 accumulate). ----
    out_ref[...] = (
        jnp.dot(h.astype(jnp.bfloat16), wfc_ref[...],
                preferred_element_type=jnp.float32)
        + bfc_ref[...]
    )


def prepare_params(params):
    """One-time parameter preparation (transpose / cast / pad / bias fuse).

    Keeps the per-call hot path free of parameter-side XLA ops.
    """
    w_ih, w_hh, b_ih, b_hh, w_fc, b_fc = (
        params["w_ih"], params["w_hh"], params["b_ih"],
        params["b_hh"], params["w_fc"], params["b_fc"],
    )
    D = w_ih.shape[1]
    H = w_hh.shape[1]
    O = w_fc.shape[0]

    wih_t = jnp.transpose(w_ih)                                   # (D, 4H)
    wih_t = jnp.pad(wih_t, ((0, D_PAD - D), (0, 0)))              # (Dp, 4H)
    return {
        "wih_t": wih_t.astype(jnp.bfloat16),                      # (Dp, 4H) bf16
        "whh_t": jnp.transpose(w_hh).astype(jnp.bfloat16),        # (H, 4H)  bf16
        "bias": (b_ih + b_hh).reshape(1, 4 * H).astype(jnp.float32),
        "wfc_t": jnp.transpose(w_fc).astype(jnp.bfloat16),        # (H, O)   bf16
        "bfc": b_fc.reshape(1, O).astype(jnp.float32),
    }


def _forward_impl(x, prepped):
    """x: (B, T, D) float32 (batch_first, like the PyTorch module)."""
    B, T, D = x.shape
    O = prepped["bfc"].shape[1]

    # Only x-side prep remains per call: pad D->128, time-major flatten, bf16.
    x_p = jnp.pad(x, ((0, 0), (0, 0), (0, D_PAD - D)))
    x_tb = (
        jnp.transpose(x_p, (1, 0, 2)).reshape(T * B, D_PAD).astype(jnp.bfloat16)
    )

    vmem = pltpu.MemorySpace.VMEM
    return pl.pallas_call(
        lstm_fc_kernel,
        out_shape=jax.ShapeDtypeStruct((B, O), jnp.float32),
        in_specs=[pl.BlockSpec(memory_space=vmem)] * 6,
        out_specs=pl.BlockSpec(memory_space=vmem),
    )(x_tb, prepped["wih_t"], prepped["whh_t"], prepped["bias"],
      prepped["wfc_t"], prepped["bfc"])


# Single jit over (x-prep + pallas_call) so the hot path is a minimal launch.
lstm_model_forward = jax.jit(_forward_impl)


def _reference_forward(x, params):
    """Pure-JAX f32 reference reproducing torch.nn.LSTM + Linear semantics."""
    w_ih, w_hh, b_ih, b_hh, w_fc, b_fc = (
        params["w_ih"], params["w_hh"], params["b_ih"],
        params["b_hh"], params["w_fc"], params["b_fc"],
    )
    B, T, D = x.shape
    H = w_hh.shape[1]
    h = jnp.zeros((B, H), jnp.float32)
    c = jnp.zeros((B, H), jnp.float32)
    for t in range(T):
        gates = x[:, t, :] @ w_ih.T + b_ih + h @ w_hh.T + b_hh
        i_g = jax.nn.sigmoid(gates[:, 0:H])
        f_g = jax.nn.sigmoid(gates[:, H:2 * H])
        g_g = jnp.tanh(gates[:, 2 * H:3 * H])
        o_g = jax.nn.sigmoid(gates[:, 3 * H:4 * H])
        c = f_g * c + i_g * g_g
        h = o_g * jnp.tanh(c)
    return h @ w_fc.T + b_fc


def init_params(key, input_size, hidden_size, output_size):
    """Deterministic init mimicking PyTorch's uniform(-1/sqrt(H), 1/sqrt(H))."""
    ks = jax.random.split(key, 6)
    bound = 1.0 / jnp.sqrt(jnp.float32(hidden_size))
    u = lambda k, shape: jax.random.uniform(k, shape, jnp.float32, -bound, bound)
    return {
        "w_ih": u(ks[0], (4 * hidden_size, input_size)),
        "w_hh": u(ks[1], (4 * hidden_size, hidden_size)),
        "b_ih": u(ks[2], (4 * hidden_size,)),
        "b_hh": u(ks[3], (4 * hidden_size,)),
        "w_fc": u(ks[4], (output_size, hidden_size)),
        "b_fc": u(ks[5], (output_size,)),
    }


if __name__ == "__main__":
    input_size = 100
    hidden_size = 32
    output_size = 4       # AG-News style: 4 class indices
    batch = 2
    seq = 8

    key = jax.random.PRNGKey(0)
    k_x, k_p = jax.random.split(key)
    x = jax.random.normal(k_x, (batch, seq, input_size), dtype=jnp.float32)
    params = init_params(k_p, input_size, hidden_size, output_size)

    prepped = prepare_params(params)          # one-time, outside the hot path
    out = lstm_model_forward(x, prepped)
    out = jax.block_until_ready(out)

    ref = _reference_forward(x, params)
    assert out.shape == (batch, output_size)
    # Tolerance reflects bf16 MXU operands (f32 accumulation) over 8 recurrent
    # steps inside the kernel.
    assert jnp.allclose(out, ref, atol=5e-2, rtol=5e-2), "mismatch vs reference"

    print("KERNEL_OK")
</pallas_src>

<mosaic_0001>
module attributes {stable_mosaic.version = 11 : i64} {
  func.func @lstm_fc_kernel(%arg0: memref<16x128xbf16, #tpu.memory_space<vmem>>, %arg1: memref<128x128xbf16, #tpu.memory_space<vmem>>, %arg2: memref<32x128xbf16, #tpu.memory_space<vmem>>, %arg3: memref<1x128xf32, #tpu.memory_space<vmem>>, %arg4: memref<32x4xbf16, #tpu.memory_space<vmem>>, %arg5: memref<1x4xf32, #tpu.memory_space<vmem>>, %arg6: memref<2x4xf32, #tpu.memory_space<vmem>>) attributes {dimension_semantics = [], scalar_prefetch = 0 : i64, scratch_operands = 0 : i64, tpu.core_type = #tpu.core_type<tc>} {
    %c0 = arith.constant 0 : index
    %c0_0 = arith.constant 0 : index
    %0 = vector.load %arg0[%c0, %c0_0] : memref<16x128xbf16, #tpu.memory_space<vmem>>, vector<16x128xbf16>
    %c0_1 = arith.constant 0 : index
    %c0_2 = arith.constant 0 : index
    %1 = vector.load %arg1[%c0_1, %c0_2] : memref<128x128xbf16, #tpu.memory_space<vmem>>, vector<128x128xbf16>
    %cst = arith.constant dense<0.000000e+00> : vector<16x128xf32>
    %2 = tpu.matmul %0, %1, %cst {dimension_numbers = #tpu.dot_dimension_numbers<[1], [0], [0], [1], [0, 0, 1, 1], [], []>} : vector<16x128xbf16>, vector<128x128xbf16>, vector<16x128xf32> -> vector<16x128xf32>
    %c0_3 = arith.constant 0 : index
    %c0_4 = arith.constant 0 : index
    %3 = vector.load %arg3[%c0_3, %c0_4] : memref<1x128xf32, #tpu.memory_space<vmem>>, vector<1x128xf32>
    %4 = vector.broadcast %3 : vector<1x128xf32> to vector<16x128xf32>
    %5 = arith.addf %2, %4 : vector<16x128xf32>
    %c0_5 = arith.constant 0 : index
    %c0_6 = arith.constant 0 : index
    %6 = vector.load %arg2[%c0_5, %c0_6] : memref<32x128xbf16, #tpu.memory_space<vmem>>, vector<32x128xbf16>
    %cst_7 = arith.constant 0.000000e+00 : f32
    %7 = vector.broadcast %cst_7 : f32 to vector<2x32xf32>
    %cst_8 = arith.constant 0.000000e+00 : f32
    %8 = vector.broadcast %cst_8 : f32 to vector<2x32xf32>
    %9 = vector.extract_strided_slice %5 {offsets = [0, 0], sizes = [2, 128], strides = [1, 1]} : vector<16x128xf32> to vector<2x128xf32>
    %10 = arith.truncf %7 : vector<2x32xf32> to vector<2x32xbf16>
    %cst_9 = arith.constant dense<0.000000e+00> : vector<2x128xf32>
    %11 = tpu.matmul %10, %6, %cst_9 {dimension_numbers = #tpu.dot_dimension_numbers<[1], [0], [0], [1], [0, 0, 1, 1], [], []>} : vector<2x32xbf16>, vector<32x128xbf16>, vector<2x128xf32> -> vector<2x128xf32>
    %12 = arith.addf %9, %11 : vector<2x128xf32>
    %cst_10 = arith.constant 5.000000e-01 : f32
    %13 = vector.broadcast %cst_10 : f32 to vector<2x128xf32>
    %14 = arith.mulf %13, %12 : vector<2x128xf32>
    %15 = math.tanh %14 : vector<2x128xf32>
    %cst_11 = arith.constant 5.000000e-01 : f32
    %16 = vector.broadcast %cst_11 : f32 to vector<2x128xf32>
    %17 = arith.mulf %16, %15 : vector<2x128xf32>
    %cst_12 = arith.constant 5.000000e-01 : f32
    %18 = vector.broadcast %cst_12 : f32 to vector<2x128xf32>
    %19 = arith.addf %17, %18 : vector<2x128xf32>
    %20 = math.tanh %12 : vector<2x128xf32>
    %21 = vector.extract_strided_slice %19 {offsets = [0, 0], sizes = [2, 32], strides = [1, 1]} : vector<2x128xf32> to vector<2x32xf32>
    %22 = vector.extract_strided_slice %19 {offsets = [0, 32], sizes = [2, 32], strides = [1, 1]} : vector<2x128xf32> to vector<2x32xf32>
    %23 = vector.extract_strided_slice %19 {offsets = [0, 96], sizes = [2, 32], strides = [1, 1]} : vector<2x128xf32> to vector<2x32xf32>
    %24 = vector.extract_strided_slice %20 {offsets = [0, 64], sizes = [2, 32], strides = [1, 1]} : vector<2x128xf32> to vector<2x32xf32>
    %25 = arith.mulf %22, %8 : vector<2x32xf32>
    %26 = arith.mulf %21, %24 : vector<2x32xf32>
    %27 = arith.addf %25, %26 : vector<2x32xf32>
    %28 = math.tanh %27 : vector<2x32xf32>
    %29 = arith.mulf %23, %28 : vector<2x32xf32>
    %30 = vector.extract_strided_slice %5 {offsets = [2, 0], sizes = [2, 128], strides = [1, 1]} : vector<16x128xf32> to vector<2x128xf32>
    %31 = arith.truncf %29 : vector<2x32xf32> to vector<2x32xbf16>
    %cst_13 = arith.constant dense<0.000000e+00> : vector<2x128xf32>
    %32 = tpu.matmul %31, %6, %cst_13 {dimension_numbers = #tpu.dot_dimension_numbers<[1], [0], [0], [1], [0, 0, 1, 1], [], []>} : vector<2x32xbf16>, vector<32x128xbf16>, vector<2x128xf32> -> vector<2x128xf32>
    %33 = arith.addf %30, %32 : vector<2x128xf32>
    %cst_14 = arith.constant 5.000000e-01 : f32
    %34 = vector.broadcast %cst_14 : f32 to vector<2x128xf32>
    %35 = arith.mulf %34, %33 : vector<2x128xf32>
    %36 = math.tanh %35 : vector<2x128xf32>
    %cst_15 = arith.constant 5.000000e-01 : f32
    %37 = vector.broadcast %cst_15 : f32 to vector<2x128xf32>
    %38 = arith.mulf %37, %36 : vector<2x128xf32>
    %cst_16 = arith.constant 5.000000e-01 : f32
    %39 = vector.broadcast %cst_16 : f32 to vector<2x128xf32>
    %40 = arith.addf %38, %39 : vector<2x128xf32>
    %41 = math.tanh %33 : vector<2x128xf32>
    %42 = vector.extract_strided_slice %40 {offsets = [0, 0], sizes = [2, 32], strides = [1, 1]} : vector<2x128xf32> to vector<2x32xf32>
    %43 = vector.extract_strided_slice %40 {offsets = [0, 32], sizes = [2, 32], strides = [1, 1]} : vector<2x128xf32> to vector<2x32xf32>
    %44 = vector.extract_strided_slice %40 {offsets = [0, 96], sizes = [2, 32], strides = [1, 1]} : vector<2x128xf32> to vector<2x32xf32>
    %45 = vector.extract_strided_slice %41 {offsets = [0, 64], sizes = [2, 32], strides = [1, 1]} : vector<2x128xf32> to vector<2x32xf32>
    %46 = arith.mulf %43, %27 : vector<2x32xf32>
    %47 = arith.mulf %42, %45 : vector<2x32xf32>
    %48 = arith.addf %46, %47 : vector<2x32xf32>
    %49 = math.tanh %48 : vector<2x32xf32>
    %50 = arith.mulf %44, %49 : vector<2x32xf32>
    %51 = vector.extract_strided_slice %5 {offsets = [4, 0], sizes = [2, 128], strides = [1, 1]} : vector<16x128xf32> to vector<2x128xf32>
    %52 = arith.truncf %50 : vector<2x32xf32> to vector<2x32xbf16>
    %cst_17 = arith.constant dense<0.000000e+00> : vector<2x128xf32>
    %53 = tpu.matmul %52, %6, %cst_17 {dimension_numbers = #tpu.dot_dimension_numbers<[1], [0], [0], [1], [0, 0, 1, 1], [], []>} : vector<2x32xbf16>, vector<32x128xbf16>, vector<2x128xf32> -> vector<2x128xf32>
    %54 = arith.addf %51, %53 : vector<2x128xf32>
    %cst_18 = arith.constant 5.000000e-01 : f32
    %55 = vector.broadcast %cst_18 : f32 to vector<2x128xf32>
    %56 = arith.mulf %55, %54 : vector<2x128xf32>
    %57 = math.tanh %56 : vector<2x128xf32>
    %cst_19 = arith.constant 5.000000e-01 : f32
    %58 = vector.broadcast %cst_19 : f32 to vector<2x128xf32>
    %59 = arith.mulf %58, %57 : vector<2x128xf32>
    %cst_20 = arith.constant 5.000000e-01 : f32
    %60 = vector.broadcast %cst_20 : f32 to vector<2x128xf32>
    %61 = arith.addf %59, %60 : vector<2x128xf32>
    %62 = math.tanh %54 : vector<2x128xf32>
    %63 = vector.extract_strided_slice %61 {offsets = [0, 0], sizes = [2, 32], strides = [1, 1]} : vector<2x128xf32> to vector<2x32xf32>
    %64 = vector.extract_strided_slice %61 {offsets = [0, 32], sizes = [2, 32], strides = [1, 1]} : vector<2x128xf32> to vector<2x32xf32>
    %65 = vector.extract_strided_slice %61 {offsets = [0, 96], sizes = [2, 32], strides = [1, 1]} : vector<2x128xf32> to vector<2x32xf32>
    %66 = vector.extract_strided_slice %62 {offsets = [0, 64], sizes = [2, 32], strides = [1, 1]} : vector<2x128xf32> to vector<2x32xf32>
    %67 = arith.mulf %64, %48 : vector<2x32xf32>
    %68 = arith.mulf %63, %66 : vector<2x32xf32>
    %69 = arith.addf %67, %68 : vector<2x32xf32>
    %70 = math.tanh %69 : vector<2x32xf32>
    %71 = arith.mulf %65, %70 : vector<2x32xf32>
    %72 = vector.extract_strided_slice %5 {offsets = [6, 0], sizes = [2, 128], strides = [1, 1]} : vector<16x128xf32> to vector<2x128xf32>
    %73 = arith.truncf %71 : vector<2x32xf32> to vector<2x32xbf16>
    %cst_21 = arith.constant dense<0.000000e+00> : vector<2x128xf32>
    %74 = tpu.matmul %73, %6, %cst_21 {dimension_numbers = #tpu.dot_dimension_numbers<[1], [0], [0], [1], [0, 0, 1, 1], [], []>} : vector<2x32xbf16>, vector<32x128xbf16>, vector<2x128xf32> -> vector<2x128xf32>
    %75 = arith.addf %72, %74 : vector<2x128xf32>
    %cst_22 = arith.constant 5.000000e-01 : f32
    %76 = vector.broadcast %cst_22 : f32 to vector<2x128xf32>
    %77 = arith.mulf %76, %75 : vector<2x128xf32>
    %78 = math.tanh %77 : vector<2x128xf32>
    %cst_23 = arith.constant 5.000000e-01 : f32
    %79 = vector.broadcast %cst_23 : f32 to vector<2x128xf32>
    %80 = arith.mulf %79, %78 : vector<2x128xf32>
    %cst_24 = arith.constant 5.000000e-01 : f32
    %81 = vector.broadcast %cst_24 : f32 to vector<2x128xf32>
    %82 = arith.addf %80, %81 : vector<2x128xf32>
    %83 = math.tanh %75 : vector<2x128xf32>
    %84 = vector.extract_strided_slice %82 {offsets = [0, 0], sizes = [2, 32], strides = [1, 1]} : vector<2x128xf32> to vector<2x32xf32>
    %85 = vector.extract_strided_slice %82 {offsets = [0, 32], sizes = [2, 32], strides = [1, 1]} : vector<2x128xf32> to vector<2x32xf32>
    %86 = vector.extract_strided_slice %82 {offsets = [0, 96], sizes = [2, 32], strides = [1, 1]} : vector<2x128xf32> to vector<2x32xf32>
    %87 = vector.extract_strided_slice %83 {offsets = [0, 64], sizes = [2, 32], strides = [1, 1]} : vector<2x128xf32> to vector<2x32xf32>
    %88 = arith.mulf %85, %69 : vector<2x32xf32>
    %89 = arith.mulf %84, %87 : vector<2x32xf32>
    %90 = arith.addf %88, %89 : vector<2x32xf32>
    %91 = math.tanh %90 : vector<2x32xf32>
    %92 = arith.mulf %86, %91 : vector<2x32xf32>
    %93 = vector.extract_strided_slice %5 {offsets = [8, 0], sizes = [2, 128], strides = [1, 1]} : vector<16x128xf32> to vector<2x128xf32>
    %94 = arith.truncf %92 : vector<2x32xf32> to vector<2x32xbf16>
    %cst_25 = arith.constant dense<0.000000e+00> : vector<2x128xf32>
    %95 = tpu.matmul %94, %6, %cst_25 {dimension_numbers = #tpu.dot_dimension_numbers<[1], [0], [0], [1], [0, 0, 1, 1], [], []>} : vector<2x32xbf16>, vector<32x128xbf16>, vector<2x128xf32> -> vector<2x128xf32>
    %96 = arith.addf %93, %95 : vector<2x128xf32>
    %cst_26 = arith.constant 5.000000e-01 : f32
    %97 = vector.broadcast %cst_26 : f32 to vector<2x128xf32>
    %98 = arith.mulf %97, %96 : vector<2x128xf32>
    %99 = math.tanh %98 : vector<2x128xf32>
    %cst_27 = arith.constant 5.000000e-01 : f32
    %100 = vector.broadcast %cst_27 : f32 to vector<2x128xf32>
    %101 = arith.mulf %100, %99 : vector<2x128xf32>
    %cst_28 = arith.constant 5.000000e-01 : f32
    %102 = vector.broadcast %cst_28 : f32 to vector<2x128xf32>
    %103 = arith.addf %101, %102 : vector<2x128xf32>
    %104 = math.tanh %96 : vector<2x128xf32>
    %105 = vector.extract_strided_slice %103 {offsets = [0, 0], sizes = [2, 32], strides = [1, 1]} : vector<2x128xf32> to vector<2x32xf32>
    %106 = vector.extract_strided_slice %103 {offsets = [0, 32], sizes = [2, 32], strides = [1, 1]} : vector<2x128xf32> to vector<2x32xf32>
    %107 = vector.extract_strided_slice %103 {offsets = [0, 96], sizes = [2, 32], strides = [1, 1]} : vector<2x128xf32> to vector<2x32xf32>
    %108 = vector.extract_strided_slice %104 {offsets = [0, 64], sizes = [2, 32], strides = [1, 1]} : vector<2x128xf32> to vector<2x32xf32>
    %109 = arith.mulf %106, %90 : vector<2x32xf32>
    %110 = arith.mulf %105, %108 : vector<2x32xf32>
    %111 = arith.addf %109, %110 : vector<2x32xf32>
    %112 = math.tanh %111 : vector<2x32xf32>
    %113 = arith.mulf %107, %112 : vector<2x32xf32>
    %114 = vector.extract_strided_slice %5 {offsets = [10, 0], sizes = [2, 128], strides = [1, 1]} : vector<16x128xf32> to vector<2x128xf32>
    %115 = arith.truncf %113 : vector<2x32xf32> to vector<2x32xbf16>
    %cst_29 = arith.constant dense<0.000000e+00> : vector<2x128xf32>
    %116 = tpu.matmul %115, %6, %cst_29 {dimension_numbers = #tpu.dot_dimension_numbers<[1], [0], [0], [1], [0, 0, 1, 1], [], []>} : vector<2x32xbf16>, vector<32x128xbf16>, vector<2x128xf32> -> vector<2x128xf32>
    %117 = arith.addf %114, %116 : vector<2x128xf32>
    %cst_30 = arith.constant 5.000000e-01 : f32
    %118 = vector.broadcast %cst_30 : f32 to vector<2x128xf32>
    %119 = arith.mulf %118, %117 : vector<2x128xf32>
    %120 = math.tanh %119 : vector<2x128xf32>
    %cst_31 = arith.constant 5.000000e-01 : f32
    %121 = vector.broadcast %cst_31 : f32 to vector<2x128xf32>
    %122 = arith.mulf %121, %120 : vector<2x128xf32>
    %cst_32 = arith.constant 5.000000e-01 : f32
    %123 = vector.broadcast %cst_32 : f32 to vector<2x128xf32>
    %124 = arith.addf %122, %123 : vector<2x128xf32>
    %125 = math.tanh %117 : vector<2x128xf32>
    %126 = vector.extract_strided_slice %124 {offsets = [0, 0], sizes = [2, 32], strides = [1, 1]} : vector<2x128xf32> to vector<2x32xf32>
    %127 = vector.extract_strided_slice %124 {offsets = [0, 32], sizes = [2, 32], strides = [1, 1]} : vector<2x128xf32> to vector<2x32xf32>
    %128 = vector.extract_strided_slice %124 {offsets = [0, 96], sizes = [2, 32], strides = [1, 1]} : vector<2x128xf32> to vector<2x32xf32>
    %129 = vector.extract_strided_slice %125 {offsets = [0, 64], sizes = [2, 32], strides = [1, 1]} : vector<2x128xf32> to vector<2x32xf32>
    %130 = arith.mulf %127, %111 : vector<2x32xf32>
    %131 = arith.mulf %126, %129 : vector<2x32xf32>
    %132 = arith.addf %130, %131 : vector<2x32xf32>
    %133 = math.tanh %132 : vector<2x32xf32>
    %134 = arith.mulf %128, %133 : vector<2x32xf32>
    %135 = vector.extract_strided_slice %5 {offsets = [12, 0], sizes = [2, 128], strides = [1, 1]} : vector<16x128xf32> to vector<2x128xf32>
    %136 = arith.truncf %134 : vector<2x32xf32> to vector<2x32xbf16>
    %cst_33 = arith.constant dense<0.000000e+00> : vector<2x128xf32>
    %137 = tpu.matmul %136, %6, %cst_33 {dimension_numbers = #tpu.dot_dimension_numbers<[1], [0], [0], [1], [0, 0, 1, 1], [], []>} : vector<2x32xbf16>, vector<32x128xbf16>, vector<2x128xf32> -> vector<2x128xf32>
    %138 = arith.addf %135, %137 : vector<2x128xf32>
    %cst_34 = arith.constant 5.000000e-01 : f32
    %139 = vector.broadcast %cst_34 : f32 to vector<2x128xf32>
    %140 = arith.mulf %139, %138 : vector<2x128xf32>
    %141 = math.tanh %140 : vector<2x128xf32>
    %cst_35 = arith.constant 5.000000e-01 : f32
    %142 = vector.broadcast %cst_35 : f32 to vector<2x128xf32>
    %143 = arith.mulf %142, %141 : vector<2x128xf32>
    %cst_36 = arith.constant 5.000000e-01 : f32
    %144 = vector.broadcast %cst_36 : f32 to vector<2x128xf32>
    %145 = arith.addf %143, %144 : vector<2x128xf32>
    %146 = math.tanh %138 : vector<2x128xf32>
    %147 = vector.extract_strided_slice %145 {offsets = [0, 0], sizes = [2, 32], strides = [1, 1]} : vector<2x128xf32> to vector<2x32xf32>
    %148 = vector.extract_strided_slice %145 {offsets = [0, 32], sizes = [2, 32], strides = [1, 1]} : vector<2x128xf32> to vector<2x32xf32>
    %149 = vector.extract_strided_slice %145 {offsets = [0, 96], sizes = [2, 32], strides = [1, 1]} : vector<2x128xf32> to vector<2x32xf32>
    %150 = vector.extract_strided_slice %146 {offsets = [0, 64], sizes = [2, 32], strides = [1, 1]} : vector<2x128xf32> to vector<2x32xf32>
    %151 = arith.mulf %148, %132 : vector<2x32xf32>
    %152 = arith.mulf %147, %150 : vector<2x32xf32>
    %153 = arith.addf %151, %152 : vector<2x32xf32>
    %154 = math.tanh %153 : vector<2x32xf32>
    %155 = arith.mulf %149, %154 : vector<2x32xf32>
    %156 = vector.extract_strided_slice %5 {offsets = [14, 0], sizes = [2, 128], strides = [1, 1]} : vector<16x128xf32> to vector<2x128xf32>
    %157 = arith.truncf %155 : vector<2x32xf32> to vector<2x32xbf16>
    %cst_37 = arith.constant dense<0.000000e+00> : vector<2x128xf32>
    %158 = tpu.matmul %157, %6, %cst_37 {dimension_numbers = #tpu.dot_dimension_numbers<[1], [0], [0], [1], [0, 0, 1, 1], [], []>} : vector<2x32xbf16>, vector<32x128xbf16>, vector<2x128xf32> -> vector<2x128xf32>
    %159 = arith.addf %156, %158 : vector<2x128xf32>
    %cst_38 = arith.constant 5.000000e-01 : f32
    %160 = vector.broadcast %cst_38 : f32 to vector<2x128xf32>
    %161 = arith.mulf %160, %159 : vector<2x128xf32>
    %162 = math.tanh %161 : vector<2x128xf32>
    %cst_39 = arith.constant 5.000000e-01 : f32
    %163 = vector.broadcast %cst_39 : f32 to vector<2x128xf32>
    %164 = arith.mulf %163, %162 : vector<2x128xf32>
    %cst_40 = arith.constant 5.000000e-01 : f32
    %165 = vector.broadcast %cst_40 : f32 to vector<2x128xf32>
    %166 = arith.addf %164, %165 : vector<2x128xf32>
    %167 = math.tanh %159 : vector<2x128xf32>
    %168 = vector.extract_strided_slice %166 {offsets = [0, 0], sizes = [2, 32], strides = [1, 1]} : vector<2x128xf32> to vector<2x32xf32>
    %169 = vector.extract_strided_slice %166 {offsets = [0, 32], sizes = [2, 32], strides = [1, 1]} : vector<2x128xf32> to vector<2x32xf32>
    %170 = vector.extract_strided_slice %166 {offsets = [0, 96], sizes = [2, 32], strides = [1, 1]} : vector<2x128xf32> to vector<2x32xf32>
    %171 = vector.extract_strided_slice %167 {offsets = [0, 64], sizes = [2, 32], strides = [1, 1]} : vector<2x128xf32> to vector<2x32xf32>
    %172 = arith.mulf %169, %153 : vector<2x32xf32>
    %173 = arith.mulf %168, %171 : vector<2x32xf32>
    %174 = arith.addf %172, %173 : vector<2x32xf32>
    %175 = math.tanh %174 : vector<2x32xf32>
    %176 = arith.mulf %170, %175 : vector<2x32xf32>
    %177 = arith.truncf %176 : vector<2x32xf32> to vector<2x32xbf16>
    %c0_41 = arith.constant 0 : index
    %c0_42 = arith.constant 0 : index
    %178 = vector.load %arg4[%c0_41, %c0_42] : memref<32x4xbf16, #tpu.memory_space<vmem>>, vector<32x4xbf16>
    %cst_43 = arith.constant dense<0.000000e+00> : vector<2x4xf32>
    %179 = tpu.matmul %177, %178, %cst_43 {dimension_numbers = #tpu.dot_dimension_numbers<[1], [0], [0], [1], [0, 0, 1, 1], [], []>} : vector<2x32xbf16>, vector<32x4xbf16>, vector<2x4xf32> -> vector<2x4xf32>
    %c0_44 = arith.constant 0 : index
    %c0_45 = arith.constant 0 : index
    %180 = vector.load %arg5[%c0_44, %c0_45] : memref<1x4xf32, #tpu.memory_space<vmem>>, vector<1x4xf32>
    %181 = vector.broadcast %180 : vector<1x4xf32> to vector<2x4xf32>
    %182 = arith.addf %179, %181 : vector<2x4xf32>
    %c0_46 = arith.constant 0 : index
    %c0_47 = arith.constant 0 : index
    %183 = vector.load %arg6[%c0_46, %c0_47] : memref<2x4xf32, #tpu.memory_space<vmem>>, vector<2x4xf32>
    tpu.vector_store %arg6[%c0_46, %c0_47], %182 {strides = array<i32>} : memref<2x4xf32, #tpu.memory_space<vmem>>, vector<2x4xf32>,
    return
  }
}

</mosaic_0001>

<bundles_post_ra>
// kernel: _forward_impl.1
= control target key start
LH: loop header
LB: loop body
LE: loop exit
PB: predicated region body
PF: predicated region fallthrough
CT: control target
= control target key end

     0   :  { %v1091_v1 = vmov 0.0   ;;  %vm1092_vm0 = vmmov 0   ;;  %s1307_s0 = inlined_call_operand.vmem [shape: bf16[16,128], index: 0, kind: input, shape index: {}]   ;;  %s1308_s1 = inlined_call_operand.vmem [shape: bf16[128,128], index: 1, kind: input, shape index: {}]   ;;  %s1309_s2 = inlined_call_operand.vmem [shape: bf16[32,128], index: 2, kind: input, shape index: {}]   ;;  %s1310_s3 = inlined_call_operand.vmem [shape: f32[1,128], index: 3, kind: input, shape index: {}]   ;;  %s1311_s4 = inlined_call_operand.vmem [shape: bf16[32,4], index: 4, kind: input, shape index: {}]   ;;  %s1312_s5 = inlined_call_operand.vmem [shape: f32[1,4], index: 5, kind: input, shape index: {}]   ;;  %s1313_s6 = inlined_call_operand.hbm [shape: f32[2,4], index: 6, kind: output, shape index: {}]  }
   0x1   :  { %v1006_v0 = vld [vmem:[%s1308_s1] sm:$0xff]   ;;  %908 = vmatprep.subr.bf16.mxu0 %v1091_v1  ;;  %928 = vmatprep.subr.bf16.mxu1 %v1091_v1  ;;  %v1007_v2 = vld [vmem:[%s1308_s1 + $0x8] sm:$0xff]   ;;  %v1008_v3 = vld [vmem:[%s1308_s1 + $0x10] sm:$0xff]  }
   0x2   :  { %909 = vmatpush3.bf16.msra.mxu0 %v1006_v0  ;;  %932 = vmatprep.mubr.msk.bf16.mxu1 %vm1092_vm0, %v1091_v1  ;;  %v1151_v4 = vld [vmem:[%s1309_s2] sm:$0xff]   ;;  %v1158_v5 = vld [vmem:[%s1309_s2 + $0x8] sm:$0xff]   ;;  %v1009_v6 = vld [vmem:[%s1308_s1 + $0x18] sm:$0xff]  }
   0x3   :  { %910 = vmatprep.subr.bf16.mxu0 %v1091_v1  ;;  %924 = vmatprep.mubr.msk.bf16.mxu0 %vm1092_vm0, %v1091_v1 }
   0x4   :  { %929 = vmatpush3.bf16.msra.mxu1 %v1151_v4 }
   0x5   :  { %930 = vmatprep.subr.bf16.mxu1 %v1091_v1 }
   0x6   :  { %911 = vmatpush3.bf16.msra.mxu0 %v1007_v2 }
   0x7   :  { %912 = vmatprep.subr.bf16.mxu0 %v1091_v1 }
   0x8   :  { %931 = vmatpush3.bf16.msra.mxu1 %v1158_v5 }
   0xa   :  { %913 = vmatpush3.bf16.msra.mxu0 %v1008_v3 }
   0xb   :  { %914 = vmatprep.subr.bf16.mxu0 %v1091_v1 }
   0xc   :  { %11 = vsyncpa [#allocation3], 0  ;;  %936 = vmatprep.subr.bf16.mxu1 %v1091_v1  ;;  %v1010_v7 = vld [vmem:[%s1308_s1 + $0x20] sm:$0xff]   ;;  %v1093_v8 = vmov 0   ;;  %v1011_v9 = vld [vmem:[%s1308_s1 + $0x28] sm:$0xff]   ;;  %s1094_s18 = smov 64  }
   0xd   :  { %933 = vmatmul.mubr.bf16.vlgmr.msra.gmra.mrb[0].mxu1 %v1093_v8  ;;  %v1013_v10 = vld [vmem:[%s1308_s1 + $0x30] sm:$0xff]   ;;  %v1015_v11 = vld [vmem:[%s1308_s1 + $0x38] sm:$0xff]   ;;  %v1016_v12 = vld [vmem:[%s1307_s0] sm:$0xff]   ;;  %vm161_vm1 = vcmask 261120   ;;  %vm833_vm2 = vcmask 25600  }
   0xe   :  { %915 = vmatpush3.bf16.msra.mxu0 %v1009_v6  ;;  %937 = vmatpush3.bf16.msra.mxu1 %v1151_v4  ;;  %v849_v17 = vld [vmem:[%s1310_s3] ss:$0 sm:$0xff]  ;;  %s1095_s3 = smov 32  }
   0xf   :  { %916 = vmatprep.subr.bf16.mxu0 %v1091_v1  ;;  %940 = vmatprep.mubr.msk.bf16.mxu1 %vm1092_vm0, %v1091_v1 }
  0x10   :  { %938 = vmatprep.subr.bf16.mxu1 %v1091_v1 }
  0x12   :  { %917 = vmatpush3.bf16.msra.mxu0 %v1010_v7  ;;  %939 = vmatpush3.bf16.msra.mxu1 %v1158_v5 }
  0x13   :  { %918 = vmatprep.subr.bf16.mxu0 %v1091_v1  ;;  %944 = vmatprep.subr.bf16.mxu1 %v1091_v1 }
  0x16   :  { %919 = vmatpush3.bf16.msra.mxu0 %v1011_v9 }
  0x17   :  { %920 = vmatprep.subr.bf16.mxu0 %v1091_v1 }
  0x1a   :  { %921 = vmatpush3.bf16.msra.mxu0 %v1013_v10 }
  0x1b   :  { %922 = vmatprep.subr.bf16.mxu0 %v1091_v1 }
  0x1e   :  { %923 = vmatpush3.bf16.msra.mxu0 %v1015_v11 }
  0x1f   :  { %960 = vmatprep.subr.bf16.mxu0 %v1091_v1 }
  0x21   :  { %925 = vmatmul.mubr.bf16.vlgmr.msra.gmra.mrb[0].mxu0 %v1016_v12 }
  0x22   :  { %961 = vmatpush3.bf16.msra.mxu0 %v1151_v4  ;;  %964 = vmatprep.mubr.msk.bf16.mxu0 %vm1092_vm0, %v1091_v1 }
  0x23   :  { %962 = vmatprep.subr.bf16.mxu0 %v1091_v1 }
  0x26   :  { %963 = vmatpush3.bf16.msra.mxu0 %v1158_v5 }
  0x27   :  { %976 = vmatprep.subr.bf16.mxu0 %v1091_v1 }
  0xe0   :  { %v199_v13 = vpop.f32.mrb[0].mxu1 }
  0xe1   :  { %v934_v14 = vpop.f32.mrb[1].mxu1 }
  0xe2   :  { %v202_v15 = vpop.f32.mrb[2].mxu1 }
  0xe3   :  { %v935_v16 = vpop.f32.mrb[3].mxu1 }
  0xf4   :  { %v138_v18 = vpop.f32.mrb[0].mxu0 }
  0xf5   :  { %v1202_v19 = vadd.f32 %v849_v17, %v138_v18  ;;  %v926_v20 = vpop.f32.mrb[1].mxu0 }
  0xf6   :  { %v141_v21 = vpop.f32.mrb[2].mxu0 }
  0xf7   :  { %v205_v22 = vadd.f32 %v199_v13, %v1202_v19  ;;  %v1205_v23 = vadd.f32 %v849_v17, %v141_v21  ;;  %v927_v24 = vpop.f32.mrb[3].mxu0 }
  0xf9   :  { %1019 = vtanh.f32 %v205_v22  ;;  %v206_v26 = vmul.f32 0.5, %v205_v22 }
  0xfb   :  { %1021 = vtanh.f32 %v206_v26 }
 0x103   :  { %v1020_v25 = vpop.eup %1019 }
 0x104   :  { %213 = vrot.lane.b32.xlu0 %v1020_v25, %s1094_s18 }
 0x105   :  { %v1022_v27 = vpop.eup %1021 }
 0x106   :  { %v208_v28 = vmul.f32 0.5, %v1022_v27 }
 0x108   :  { %v209_v29 = vadd.f32 0.5, %v208_v28 }
 0x10a   :  { %v211_v32 = vmul.f32 0.0, %v209_v29 }
 0x176   :  { %v214_v30 = vpop.permute.xlu0 %213 }
 0x177   :  { %v216_v31 = vmul.f32 %v214_v30, %v209_v29 }
 0x179   :  { %218 = vrot.lane.b32.xlu0 %v216_v31, %s1095_s3 }
 0x1eb   :  { %v219_v33 = vpop.permute.xlu0 %218 }
 0x1ec   :  { %v221_v34 = vadd.f32 %v219_v33, %v211_v32 }
 0x1ee   :  { %1023 = vtanh.f32 %v221_v34  ;;  %v285_v53 = vrot.slane %v221_v34, 6 }
 0x1f8   :  { %v1024_v35 = vpop.eup %1023 }
 0x1f9   :  { %224 = vrot.lane.b32.xlu1 %v1024_v35, %s1094_s18 }
 0x26b   :  { %v225_v36 = vpop.permute.xlu1 %224 }
 0x26c   :  { %v227_v37 = vmul.f32 %v225_v36, %v209_v29 }
 0x26e   :  { %v228_v38 = vpack.c.bf16 %v227_v37, %v227_v37 }
 0x270   :  { %230 = vrot.lane.b32.xlu1 %v228_v38, %s1095_s3 }
 0x2e2   :  { %v231_v39 = vpop.permute.xlu1 %230 }
 0x2e3   :  { %941 = vmatmul.mubr.msk.bf16.vlgmr.msra.gmra.mrb[4].mxu1 %vm161_vm1, %v231_v39 }
 0x2e4   :  { %945 = vmatpush3.bf16.msra.mxu1 %v1151_v4  ;;  %948 = vmatprep.mubr.msk.bf16.mxu1 %vm1092_vm0, %v1091_v1 }
 0x2e5   :  { %946 = vmatprep.subr.bf16.mxu1 %v1091_v1 }
 0x2e8   :  { %947 = vmatpush3.bf16.msra.mxu1 %v1158_v5 }
 0x2e9   :  { %952 = vmatprep.subr.bf16.mxu1 %v1091_v1 }
 0x3b6   :  { %v269_v40 = vpop.f32.mrb[4].mxu1 }
 0x3b7   :  { %v276_v41 = vrot.slane %v269_v40, 6  ;;  %v942_v42 = vpop.f32.mrb[5].mxu1 }
 0x3b8   :  { %v272_v43 = vpop.f32.mrb[6].mxu1 }
 0x3b9   :  { %v278_v44 = vadd.f32 %v276_v41, %v1202_v19  ;;  %v943_v45 = vpop.f32.mrb[7].mxu1 }
 0x3bb   :  { %1025 = vtanh.f32 %v278_v44  ;;  %v279_v47 = vmul.f32 0.5, %v278_v44 }
 0x3bd   :  { %1027 = vtanh.f32 %v279_v47 }
 0x3c5   :  { %v1026_v46 = vpop.eup %1025 }
 0x3c6   :  { %289 = vrot.lane.b32.xlu0 %v1026_v46, %s1094_s18 }
 0x3c7   :  { %v1028_v48 = vpop.eup %1027 }
 0x3c8   :  { %v281_v49 = vmul.f32 0.5, %v1028_v48 }
 0x3ca   :  { %v282_v50 = vadd.f32 0.5, %v281_v49 }
 0x3cc   :  { %v287_v54 = vmul.f32 %v285_v53, %v282_v50 }
 0x438   :  { %v290_v51 = vpop.permute.xlu0 %289 }
 0x439   :  { %v292_v52 = vmul.f32 %v290_v51, %v282_v50 }
 0x43b   :  { %294 = vrot.lane.b32.xlu1 %v292_v52, %s1095_s3 }
 0x4ad   :  { %v295_v55 = vpop.permute.xlu1 %294 }
 0x4ae   :  { %v297_v56 = vadd.f32 %v295_v55, %v287_v54 }
 0x4b0   :  { %1029 = vtanh.f32 %v297_v56  ;;  %v362_v15 = vrot.slane %v297_v56, 6 }
 0x4ba   :  { %v1030_v57 = vpop.eup %1029 }
 0x4bb   :  { %300 = vrot.lane.b32.xlu0 %v1030_v57, %s1094_s18 }
 0x52d   :  { %v301_v58 = vpop.permute.xlu0 %300 }
 0x52e   :  { %v303_v59 = vmul.f32 %v301_v58, %v282_v50 }
 0x530   :  { %v304_v60 = vpack.c.bf16 %v303_v59, %v303_v59 }
 0x532   :  { %v306_v61 = vrot.slane %v304_v60, 1 }
 0x534   :  { %307 = vrot.lane.b32.xlu1 %v306_v61, %s1095_s3 }
 0x5a6   :  { %v308_v62 = vpop.permute.xlu1 %307 }
 0x5a7   :  { %949 = vmatmul.mubr.msk.bf16.vlgmr.msra.gmra.mrb[8].mxu1 %vm161_vm1, %v308_v62 }
 0x5a8   :  { %953 = vmatpush3.bf16.msra.mxu1 %v1151_v4  ;;  %956 = vmatprep.mubr.msk.bf16.mxu1 %vm1092_vm0, %v1091_v1 }
 0x5a9   :  { %954 = vmatprep.subr.bf16.mxu1 %v1091_v1 }
 0x5ac   :  { %955 = vmatpush3.bf16.msra.mxu1 %v1158_v5 }
 0x5ad   :  { %968 = vmatprep.subr.bf16.mxu1 %v1091_v1 }
 0x67a   :  { %v346_v63 = vpop.f32.mrb[8].mxu1 }
 0x67b   :  { %v353_v0 = vrot.slane %v346_v63, 4  ;;  %v950_v2 = vpop.f32.mrb[9].mxu1 }
 0x67c   :  { %v349_v3 = vpop.f32.mrb[10].mxu1 }
 0x67d   :  { %v355_v6 = vadd.f32 %v353_v0, %v1202_v19  ;;  %v951_v7 = vpop.f32.mrb[11].mxu1 }
 0x67f   :  { %1031 = vtanh.f32 %v355_v6  ;;  %v356_v9 = vmul.f32 0.5, %v355_v6 }
 0x681   :  { %1033 = vtanh.f32 %v356_v9 }
 0x689   :  { %v1032_v8 = vpop.eup %1031 }
 0x68a   :  { %366 = vrot.lane.b32.xlu0 %v1032_v8, %s1094_s18 }
 0x68b   :  { %v1034_v10 = vpop.eup %1033 }
 0x68c   :  { %v358_v11 = vmul.f32 0.5, %v1034_v10 }
 0x68e   :  { %v359_v12 = vadd.f32 0.5, %v358_v11 }
 0x690   :  { %v364_v16 = vmul.f32 %v362_v15, %v359_v12 }
 0x6fc   :  { %v367_v13 = vpop.permute.xlu0 %366 }
 0x6fd   :  { %v369_v14 = vmul.f32 %v367_v13, %v359_v12 }
 0x6ff   :  { %371 = vrot.lane.b32.xlu1 %v369_v14, %s1095_s3 }
 0x771   :  { %v372_v17 = vpop.permute.xlu1 %371 }
 0x772   :  { %v374_v18 = vadd.f32 %v372_v17, %v364_v16 }
 0x774   :  { %1035 = vtanh.f32 %v374_v18  ;;  %v439_v40 = vrot.slane %v374_v18, 6 }
 0x77e   :  { %v1036_v20 = vpop.eup %1035 }
 0x77f   :  { %377 = vrot.lane.b32.xlu0 %v1036_v20, %s1094_s18 }
 0x7f1   :  { %v378_v21 = vpop.permute.xlu0 %377 }
 0x7f2   :  { %v380_v22 = vmul.f32 %v378_v21, %v359_v12 }
 0x7f4   :  { %v381_v24 = vpack.c.bf16 %v380_v22, %v380_v22 }
 0x7f6   :  { %v383_v25 = vrot.slane %v381_v24, 2 }
 0x7f8   :  { %384 = vrot.lane.b32.xlu1 %v383_v25, %s1095_s3 }
 0x86a   :  { %v385_v26 = vpop.permute.xlu1 %384 }
 0x86b   :  { %957 = vmatmul.mubr.msk.bf16.vlgmr.msra.gmra.mrb[12].mxu1 %vm161_vm1, %v385_v26 }
 0x86c   :  { %969 = vmatpush3.bf16.msra.mxu1 %v1151_v4  ;;  %972 = vmatprep.mubr.msk.bf16.mxu1 %vm1092_vm0, %v1091_v1 }
 0x86d   :  { %970 = vmatprep.subr.bf16.mxu1 %v1091_v1 }
 0x870   :  { %971 = vmatpush3.bf16.msra.mxu1 %v1158_v5 }
 0x871   :  { %984 = vmatprep.subr.bf16.mxu1 %v1091_v1 }
 0x93e   :  { %v423_v27 = vpop.f32.mrb[12].mxu1 }
 0x93f   :  { %v430_v28 = vrot.slane %v423_v27, 2  ;;  %v958_v29 = vpop.f32.mrb[13].mxu1 }
 0x940   :  { %v426_v30 = vpop.f32.mrb[14].mxu1 }
 0x941   :  { %v432_v31 = vadd.f32 %v430_v28, %v1202_v19  ;;  %v959_v32 = vpop.f32.mrb[15].mxu1 }
 0x943   :  { %1037 = vtanh.f32 %v432_v31  ;;  %v433_v34 = vmul.f32 0.5, %v432_v31 }
 0x945   :  { %1039 = vtanh.f32 %v433_v34 }
 0x94d   :  { %v1038_v33 = vpop.eup %1037 }
 0x94e   :  { %443 = vrot.lane.b32.xlu0 %v1038_v33, %s1094_s18 }
 0x94f   :  { %v1040_v35 = vpop.eup %1039 }
 0x950   :  { %v435_v36 = vmul.f32 0.5, %v1040_v35 }
 0x952   :  { %v436_v37 = vadd.f32 0.5, %v435_v36 }
 0x954   :  { %v441_v41 = vmul.f32 %v439_v40, %v436_v37 }
 0x9c0   :  { %v444_v38 = vpop.permute.xlu0 %443 }
 0x9c1   :  { %v446_v39 = vmul.f32 %v444_v38, %v436_v37 }
 0x9c3   :  { %448 = vrot.lane.b32.xlu1 %v446_v39, %s1095_s3 }
 0xa35   :  { %v449_v42 = vpop.permute.xlu1 %448 }
 0xa36   :  { %v451_v43 = vadd.f32 %v449_v42, %v441_v41 }
 0xa38   :  { %1041 = vtanh.f32 %v451_v43  ;;  %v513_v61 = vrot.slane %v451_v43, 6 }
 0xa42   :  { %v1042_v19 = vpop.eup %1041 }
 0xa43   :  { %454 = vrot.lane.b32.xlu0 %v1042_v19, %s1094_s18 }
 0xab5   :  { %v455_v44 = vpop.permute.xlu0 %454 }
 0xab6   :  { %v457_v45 = vmul.f32 %v455_v44, %v436_v37 }
 0xab8   :  { %v458_v46 = vpack.c.bf16 %v457_v45, %v457_v45 }
 0xaba   :  { %v460_v47 = vrot.slane %v458_v46, 3 }
 0xabc   :  { %461 = vrot.lane.b32.xlu1 %v460_v47, %s1095_s3 }
 0xb2e   :  { %v462_v48 = vpop.permute.xlu1 %461 }
 0xb2f   :  { %965 = vmatmul.mubr.msk.bf16.vlgmr.msra.gmra.mrb[4].mxu0 %vm161_vm1, %v462_v48 }
 0xb30   :  { %977 = vmatpush3.bf16.msra.mxu0 %v1151_v4  ;;  %980 = vmatprep.mubr.msk.bf16.mxu0 %vm1092_vm0, %v1091_v1 }
 0xb31   :  { %978 = vmatprep.subr.bf16.mxu0 %v1091_v1 }
 0xb34   :  { %979 = vmatpush3.bf16.msra.mxu0 %v1158_v5 }
 0xb35   :  { %992 = vmatprep.subr.bf16.mxu0 %v1091_v1 }
 0xc02   :  { %v500_v49 = vpop.f32.mrb[4].mxu0 }
 0xc03   :  { %v506_v50 = vadd.f32 %v500_v49, %v1205_v23  ;;  %v966_v51 = vpop.f32.mrb[5].mxu0 }
 0xc04   :  { %v503_v52 = vpop.f32.mrb[6].mxu0 }
 0xc05   :  { %1043 = vtanh.f32 %v506_v50  ;;  %v967_v53 = vpop.f32.mrb[7].mxu0  ;;  %v507_v55 = vmul.f32 0.5, %v506_v50 }
 0xc07   :  { %1045 = vtanh.f32 %v507_v55 }
 0xc0f   :  { %v1044_v54 = vpop.eup %1043 }
 0xc10   :  { %517 = vrot.lane.b32.xlu0 %v1044_v54, %s1094_s18 }
 0xc11   :  { %v1046_v56 = vpop.eup %1045 }
 0xc12   :  { %v509_v57 = vmul.f32 0.5, %v1046_v56 }
 0xc14   :  { %v510_v58 = vadd.f32 0.5, %v509_v57 }
 0xc16   :  { %v515_v62 = vmul.f32 %v513_v61, %v510_v58 }
 0xc82   :  { %v518_v59 = vpop.permute.xlu0 %517 }
 0xc83   :  { %v520_v60 = vmul.f32 %v518_v59, %v510_v58 }
 0xc85   :  { %522 = vrot.lane.b32.xlu1 %v520_v60, %s1095_s3 }
 0xcf7   :  { %v523_v63 = vpop.permute.xlu1 %522 }
 0xcf8   :  { %v525_v0 = vadd.f32 %v523_v63, %v515_v62 }
 0xcfa   :  { %1047 = vtanh.f32 %v525_v0 }
 0xd04   :  { %v1048_v2 = vpop.eup %1047 }
 0xd05   :  { %528 = vrot.lane.b32.xlu0 %v1048_v2, %s1094_s18 }
 0xd77   :  { %v529_v3 = vpop.permute.xlu0 %528 }
 0xd78   :  { %v531_v6 = vmul.f32 %v529_v3, %v510_v58 }
 0xd7a   :  { %v532_v7 = vpack.c.bf16 %v531_v6, %v531_v6 }
 0xd7c   :  { %534 = vrot.lane.b32.xlu1 %v532_v7, %s1095_s3 }
 0xdee   :  { %v535_v8 = vpop.permute.xlu1 %534 }
 0xdef   :  { %973 = vmatmul.mubr.msk.bf16.vlgmr.msra.gmra.mrb[16].mxu1 %vm161_vm1, %v535_v8 }
 0xdf0   :  { %985 = vmatpush3.bf16.msra.mxu1 %v1151_v4  ;;  %988 = vmatprep.mubr.msk.bf16.mxu1 %vm1092_vm0, %v1091_v1 }
 0xdf1   :  { %986 = vmatprep.subr.bf16.mxu1 %v1091_v1 }
 0xdf4   :  { %987 = vmatpush3.bf16.msra.mxu1 %v1158_v5  ;;  %v589_v5 = vrot.slane %v525_v0, 6 }
 0xec2   :  { %v573_v9 = vpop.f32.mrb[16].mxu1 }
 0xec3   :  { %v580_v10 = vrot.slane %v573_v9, 6  ;;  %v974_v11 = vpop.f32.mrb[17].mxu1 }
 0xec4   :  { %v576_v12 = vpop.f32.mrb[18].mxu1 }
 0xec5   :  { %v582_v13 = vadd.f32 %v580_v10, %v1205_v23  ;;  %v975_v14 = vpop.f32.mrb[19].mxu1  ;;  %v1018_v10 = vld [vmem:[%s1311_s4 + $0x8] sm:$0xff]  }
 0xec7   :  { %1049 = vtanh.f32 %v582_v13  ;;  %v583_v16 = vmul.f32 0.5, %v582_v13 }
 0xec9   :  { %1051 = vtanh.f32 %v583_v16 }
 0xed1   :  { %v1050_v15 = vpop.eup %1049 }
 0xed2   :  { %593 = vrot.lane.b32.xlu0 %v1050_v15, %s1094_s18 }
 0xed3   :  { %v1052_v4 = vpop.eup %1051 }
 0xed4   :  { %v585_v17 = vmul.f32 0.5, %v1052_v4  ;;  %v868_v4 = vld [vmem:[%s1312_s5] ss:$0 sm:$0xff] }
 0xed6   :  { %v586_v18 = vadd.f32 0.5, %v585_v17 }
 0xed8   :  { %v591_v22 = vmul.f32 %v589_v5, %v586_v18 }
 0xf44   :  { %v594_v20 = vpop.permute.xlu0 %593 }
 0xf45   :  { %v596_v21 = vmul.f32 %v594_v20, %v586_v18 }
 0xf47   :  { %598 = vrot.lane.b32.xlu1 %v596_v21, %s1095_s3 }
 0xfb9   :  { %v599_v24 = vpop.permute.xlu1 %598 }
 0xfba   :  { %v601_v25 = vadd.f32 %v599_v24, %v591_v22 }
 0xfbc   :  { %1053 = vtanh.f32 %v601_v25  ;;  %v666_v44 = vrot.slane %v601_v25, 6 }
 0xfc6   :  { %v1054_v26 = vpop.eup %1053 }
 0xfc7   :  { %604 = vrot.lane.b32.xlu0 %v1054_v26, %s1094_s18 }
0x1039   :  { %v605_v27 = vpop.permute.xlu0 %604 }
0x103a   :  { %v607_v28 = vmul.f32 %v605_v27, %v586_v18 }
0x103c   :  { %v608_v29 = vpack.c.bf16 %v607_v28, %v607_v28 }
0x103e   :  { %v610_v30 = vrot.slane %v608_v29, 1 }
0x1040   :  { %611 = vrot.lane.b32.xlu1 %v610_v30, %s1095_s3 }
0x10b2   :  { %v612_v31 = vpop.permute.xlu1 %611 }
0x10b3   :  { %981 = vmatmul.mubr.msk.bf16.vlgmr.msra.gmra.mrb[8].mxu0 %vm161_vm1, %v612_v31 }
0x10b4   :  { %996 = vmatprep.mubr.msk.bf16.mxu0 %vm1092_vm0, %v1091_v1 }
0x1186   :  { %v650_v32 = vpop.f32.mrb[8].mxu0 }
0x1187   :  { %v657_v33 = vrot.slane %v650_v32, 4  ;;  %v982_v34 = vpop.f32.mrb[9].mxu0 }
0x1188   :  { %v653_v35 = vpop.f32.mrb[10].mxu0 }
0x1189   :  { %v659_v36 = vadd.f32 %v657_v33, %v1205_v23  ;;  %v983_v37 = vpop.f32.mrb[11].mxu0 }
0x118b   :  { %1055 = vtanh.f32 %v659_v36  ;;  %v660_v39 = vmul.f32 0.5, %v659_v36 }
0x118d   :  { %1057 = vtanh.f32 %v660_v39 }
0x1195   :  { %v1056_v38 = vpop.eup %1055 }
0x1196   :  { %670 = vrot.lane.b32.xlu0 %v1056_v38, %s1094_s18 }
0x1197   :  { %v1058_v40 = vpop.eup %1057 }
0x1198   :  { %v662_v41 = vmul.f32 0.5, %v1058_v40 }
0x119a   :  { %v663_v42 = vadd.f32 0.5, %v662_v41 }
0x119c   :  { %v668_v45 = vmul.f32 %v666_v44, %v663_v42 }
0x1208   :  { %v671_v43 = vpop.permute.xlu0 %670 }
0x1209   :  { %v673_v19 = vmul.f32 %v671_v43, %v663_v42 }
0x120b   :  { %675 = vrot.lane.b32.xlu1 %v673_v19, %s1095_s3 }
0x127d   :  { %v676_v46 = vpop.permute.xlu1 %675 }
0x127e   :  { %v678_v47 = vadd.f32 %v676_v46, %v668_v45 }
0x1280   :  { %1059 = vtanh.f32 %v678_v47  ;;  %v743_v6 = vrot.slane %v678_v47, 6 }
0x128a   :  { %v1060_v48 = vpop.eup %1059 }
0x128b   :  { %681 = vrot.lane.b32.xlu0 %v1060_v48, %s1094_s18 }
0x12fd   :  { %v682_v49 = vpop.permute.xlu0 %681 }
0x12fe   :  { %v684_v50 = vmul.f32 %v682_v49, %v663_v42 }
0x1300   :  { %v685_v51 = vpack.c.bf16 %v684_v50, %v684_v50 }
0x1302   :  { %v687_v52 = vrot.slane %v685_v51, 2 }
0x1304   :  { %688 = vrot.lane.b32.xlu1 %v687_v52, %s1095_s3 }
0x1376   :  { %v689_v53 = vpop.permute.xlu1 %688 }
0x1377   :  { %989 = vmatmul.mubr.msk.bf16.vlgmr.msra.gmra.mrb[20].mxu1 %vm161_vm1, %v689_v53 }
0x144a   :  { %v727_v54 = vpop.f32.mrb[20].mxu1 }
0x144b   :  { %v734_v55 = vrot.slane %v727_v54, 2  ;;  %v990_v56 = vpop.f32.mrb[21].mxu1 }
0x144c   :  { %v730_v57 = vpop.f32.mrb[22].mxu1 }
0x144d   :  { %v736_v58 = vadd.f32 %v734_v55, %v1205_v23  ;;  %v991_v59 = vpop.f32.mrb[23].mxu1  ;;  %v1017_v23 = vld [vmem:[%s1311_s4] sm:$0xff]   ;;  %s1096_s4 = smov [#allocation2]  }
0x144e   :  { %993 = vmatpush3.bf16.msra.mxu0 %v1017_v23  ;;  %s841_s25 = sshll.u32 %s1096_s4, 4  ;;  %s842_s25 = int_to_ptr.vmem [resolvable:$true] %s841_s25 }
0x144f   :  { %1061 = vtanh.f32 %v736_v58  ;;  %v737_v61 = vmul.f32 0.5, %v736_v58  ;;  %994 = vmatprep.subr.bf16.mxu0 %v1091_v1  ;;  %s1067_s26 = scalar_lea.vmem %s842_s25, 32  ;;  %p1072_p1 = scmp.lt.s32.totalorder %s842_s25, %s842_s25 }
0x1450   :  { %p1068_p0 = scmp.ne.s32.totalorder %s842_s25, %s1067_s26  ;;  %p1073_p2 = scmp.lt.s32.totalorder %s1067_s26, %s1067_s26 }
0x1451   :  { %1063 = vtanh.f32 %v737_v61 }
0x1452   :  { %995 = vmatpush3.bf16.msra.mxu0 %v1018_v10  ;;  %p1074_p3 = por %p1073_p2, %p1072_p1 }
0x1454   :  { %p1075_p4 = pnand %p1074_p3, %p1068_p0 }
0x1459   :  { %v1062_v60 = vpop.eup %1061 }
0x145a   :  { %747 = vrot.lane.b32.xlu0 %v1062_v60, %s1094_s18 }
0x145b   :  { %v1064_v62 = vpop.eup %1063 }
0x145c   :  { %v739_v63 = vmul.f32 0.5, %v1064_v62 }
0x145e   :  { %v740_v0 = vadd.f32 0.5, %v739_v63 }
0x1460   :  { %v745_v7 = vmul.f32 %v743_v6, %v740_v0 }
0x14cc   :  { %v748_v2 = vpop.permute.xlu0 %747 }
0x14cd   :  { %v750_v3 = vmul.f32 %v748_v2, %v740_v0 }
0x14cf   :  { %752 = vrot.lane.b32.xlu1 %v750_v3, %s1095_s3 }
0x1541   :  { %v753_v8 = vpop.permute.xlu1 %752 }
0x1542   :  { %v755_v9 = vadd.f32 %v753_v8, %v745_v7 }
0x1544   :  { %1065 = vtanh.f32 %v755_v9 }
0x154e   :  { %v1066_v11 = vpop.eup %1065 }
0x154f   :  { %758 = vrot.lane.b32.xlu0 %v1066_v11, %s1094_s18 }
0x15c1   :  { %v759_v12 = vpop.permute.xlu0 %758 }
0x15c2   :  { %v761_v13 = vmul.f32 %v759_v12, %v740_v0 }
0x15c4   :  { %v762_v14 = vpack.c.bf16 %v761_v13, %v761_v13 }
0x15c6   :  { %v775_v15 = vrot.slane %v762_v14, 3 }
0x15c8   :  { %776 = vrot.lane.b32.xlu1 %v775_v15, %s1095_s3 }
0x163a   :  { %v777_v16 = vpop.permute.xlu1 %776 }
0x163b   :  { %997 = vmatmul.mubr.msk.bf16.vlgmr.msra.gmra.mrb[12].mxu0 %vm161_vm1, %v777_v16 }
0x170e   :  { %v827_v1 = vpop.f32.mrb[12].mxu0 }
0x170f   :  { %v828_v17 = vadd.f32 %v868_v4, %v827_v1  ;;  %v998_v18 = vpop.f32.mrb[13].mxu0 }
0x1710   :  { %v830_v20 = vpop.f32.mrb[14].mxu0 }
0x1711   :  { %v999_v21 = vpop.f32.mrb[15].mxu0  ;;  %834 = vst.msk [vmem:[#allocation2] sm:$0x3] %vm833_vm2, %v828_v17 }
0x1712   :  { %1078 = shalt.err (!%p1075_p4)
}
0x1713   :  { %s1079_s5 = scalar_lea.hbm %s1313_s6, 32 }
0x1714   :  { %p1080_p5 = scmp.ne.s32.totalorder %s1313_s6, %s1079_s5  ;;  %p1083_p6 = scmp.lt.u32.totalorder %s1079_s5, %s1313_s6 }
0x1716   :  { %p1085_p7 = pnand %p1083_p6, %p1080_p5 }
0x1718   :  { %1088 = shalt.err (!%p1085_p7)
}
0x1719   :  { %844 = dma.vmem_to_hbm [thread:$0]  %s842_s25, 32, %s1313_s6, [#allocation3]  }
0x171a   :  { %1089 = dma.done.wait [#allocation3], 32  }
0x171b   :  { %1090 = vsyncadd [#allocation3], 4294967264 }
0x171c   :  { %848 = vsyncpa [#allocation3], 1 }

</bundles_post_ra>
